<compile_context>
chip_gen: v7x
topology: tpu7x:2x2x1
jax: 0.10.0
libtpu: 0.0.40
codegen_flags: <defaults>
</compile_context>

<pallas_src>
import jax
import jax.numpy as jnp
from jax import lax
from jax.experimental import pallas as pl
from jax.experimental.pallas import tpu as pltpu


def _round_up(x: int, m: int) -> int:
    return ((x + m - 1) // m) * m


def _vmem_budget_bytes() -> int:
    """Generation-gated VMEM budget for tiling (leave headroom for Mosaic)."""
    cap = 64 << 20
    try:
        info = pltpu.get_tpu_info()
        cap = int(getattr(info, "vmem_capacity_bytes", cap))
    except Exception:
        pass
    # v7x: 64 MiB per TensorCore -> ~40 MiB budget; v5e/v6e: 128 MiB -> ~96 MiB.
    return (40 << 20) if cap <= (80 << 20) else (96 << 20)


def _pick_tk(K: int, cap: int = 1024) -> int:
    """Pick a K tile that avoids K padding when possible."""
    if K <= cap:
        return K                      # full-K block: no padding, 1 K step
    for cand in range(cap, 127, -128):
        if K % cand == 0:             # largest 128-multiple divisor <= cap
            return cand
    return cap                        # fall back to padding K


# ----------------------------------------------------------------------------
# Kernels
# ----------------------------------------------------------------------------
def _gemm_single_block_kernel(x_ref, wt_ref, b_ref, o_ref):
    """Whole problem in one VMEM block: y = x @ w_t + b."""
    acc = jnp.dot(x_ref[...], wt_ref[...], preferred_element_type=jnp.float32)
    o_ref[...] = (acc + b_ref[...]).astype(o_ref.dtype)


def _gemm_tiled_kernel(x_ref, wt_ref, b_ref, o_ref, acc_ref):
    """One (tm, tn) output tile; K is the innermost ('arbitrary') grid axis.

    x_ref  : [tm, tk] bf16
    wt_ref : [tk, tn] bf16  (weight pre-transposed to [K, N])
    b_ref  : [1,  tn] f32
    o_ref  : [tm, tn] out_dtype (bf16 by default)
    acc_ref: [tm, tn] f32 VMEM scratch (persists across K steps)
    """
    k = pl.program_id(2)

    @pl.when(k == 0)
    def _():
        # Bias initializes the accumulator: no epilogue add needed.
        acc_ref[...] = jnp.broadcast_to(b_ref[...], acc_ref.shape)

    # MXU matmul: bf16 operands, f32 accumulation; no in-kernel transpose.
    acc_ref[...] += jnp.dot(x_ref[...], wt_ref[...],
                            preferred_element_type=jnp.float32)

    @pl.when(k == pl.num_programs(2) - 1)
    def _():
        o_ref[...] = acc_ref[...].astype(o_ref.dtype)


# ----------------------------------------------------------------------------
# Wrapper
# ----------------------------------------------------------------------------
def default_gemm(x: jax.Array, w_t: jax.Array, b: jax.Array, *,
                 out_dtype=jnp.bfloat16,
                 tm: int | None = None, tn: int | None = None,
                 tk: int | None = None,
                 force_tiled: bool = False) -> jax.Array:
    """y = x @ w_t + b with x:[M,K], w_t:[K,N] (pre-transposed), b:[N] or [1,N]."""
    M, K = x.shape
    K2, N = w_t.shape
    assert K == K2, "in_features mismatch"
    b2d = (b.reshape(1, N) if b.ndim == 1 else b).astype(jnp.float32)
    assert b2d.shape == (1, N)

    # Cast operands BEFORE any padding (halves pad-copy bytes).
    x_bf = x.astype(jnp.bfloat16)
    w_bf = w_t.astype(jnp.bfloat16)
    out_bytes = jnp.dtype(out_dtype).itemsize

    # ---- small-problem fast path: one block, no grid, no pad, no scratch ----
    problem_bytes = M * K * 2 + K * N * 2 + M * N * 4 + N * 4
    if not force_tiled and problem_bytes <= (2 << 20):
        return pl.pallas_call(
            _gemm_single_block_kernel,
            out_shape=jax.ShapeDtypeStruct((M, N), out_dtype),
        )(x_bf, w_bf, b2d)

    # ---- tiled path: 512x512 output-stationary tiles, tk up to 1024 --------
    budget = _vmem_budget_bytes()
    if tm is None:
        tm = min(512, _round_up(M, 16))      # bf16 LHS packs 16 sublanes/vreg
    if tn is None:
        tn = min(512, _round_up(N, 128))     # lane-dense output
    if tk is None:
        tk = _pick_tk(K, 1024)

    def footprint(tm_, tn_, tk_):
        # double-buffered inputs + double-buffered output + single f32 acc
        return (2 * (tm_ * tk_ * 2 + tk_ * tn_ * 2 + tn_ * 4)
                + 2 * tm_ * tn_ * out_bytes
                + tm_ * tn_ * 4)

    # Safety net: shrink to budget (rarely triggers with these caps).
    while footprint(tm, tn, tk) > budget:
        if tk >= 256:
            tk = max(128, _round_up(tk // 2, 128))
        elif tn >= 256:
            tn = max(128, _round_up(tn // 2, 128))
        elif tm >= 32:
            tm = max(16, _round_up(tm // 2, 16))
        else:
            break

    Mp, Kp, Np = _round_up(M, tm), _round_up(K, tk), _round_up(N, tn)

    # Zero K-padding is exact; M/N padding is sliced off after the call.
    xp = x_bf if (Mp == M and Kp == K) else jnp.pad(x_bf, ((0, Mp - M), (0, Kp - K)))
    wp = w_bf if (Kp == K and Np == N) else jnp.pad(w_bf, ((0, Kp - K), (0, Np - N)))
    bp = b2d if Np == N else jnp.pad(b2d, ((0, 0), (0, Np - N)))

    grid = (Mp // tm, Np // tn, Kp // tk)
    vmem_limit = int(min(max(footprint(tm, tn, tk) + (4 << 20), 16 << 20), budget))

    out = pl.pallas_call(
        _gemm_tiled_kernel,
        out_shape=jax.ShapeDtypeStruct((Mp, Np), out_dtype),
        grid_spec=pltpu.PrefetchScalarGridSpec(
            num_scalar_prefetch=0,
            grid=grid,
            in_specs=[
                pl.BlockSpec((tm, tk), lambda i, j, k: (i, k)),
                pl.BlockSpec((tk, tn), lambda i, j, k: (k, j)),
                pl.BlockSpec((1, tn), lambda i, j, k: (0, j)),
            ],
            out_specs=pl.BlockSpec((tm, tn), lambda i, j, k: (i, j)),
            scratch_shapes=[pltpu.VMEM((tm, tn), jnp.float32)],
        ),
        compiler_params=pltpu.CompilerParams(
            dimension_semantics=("parallel", "parallel", "arbitrary"),
            vmem_limit_bytes=vmem_limit,
        ),
    )(xp, wp, bp)

    if Mp == M and Np == N:
        return out
    return out[:M, :N]


# ----------------------------------------------------------------------------
# Module
# ----------------------------------------------------------------------------
class MockModulePallas:
    """JAX/Pallas analogue of the PyTorch MockModule ('linear' default GEMM)."""

    def __init__(self, module_type: str = "linear", has_quantizers: bool = False,
                 in_features: int = 32, out_features: int = 16):
        self.module_type = module_type
        # Same metadata-only quantizer stubs as the PyTorch mock.
        self.input_quantizer = type("InputQuantizer", (), {"num_bits": (4, 3)})()
        self.weight_quantizer = type("WeightQuantizer", (), {"num_bits": (4, 3)})()

        # Deterministic synthetic parameters (the mock has none; these back
        # the implied default GEMM).  Weight preprocessing is hoisted here:
        # pre-transposed to [K, N] and cast to bf16 once; bias stored (1, N).
        kw, kb = jax.random.split(jax.random.PRNGKey(42))
        w_f32 = jax.random.normal(kw, (out_features, in_features),
                                  dtype=jnp.float32) * 0.05
        self.weight_t = w_f32.T.astype(jnp.bfloat16)                    # [K, N] bf16
        self.bias_2d = (jax.random.normal(kb, (out_features,), dtype=jnp.float32)
                        * 0.05).reshape(1, out_features)                # [1, N] f32

    def forward(self, input, args=(), kwargs=None):
        # The PyTorch mock returns the constant 'default_gemm_called'; we run
        # the default GEMM kernel it represents and return both.
        y = default_gemm(input, self.weight_t, self.bias_2d)
        return "default_gemm_called", y


if __name__ == "__main__":
    # --- mock problem size (small -> single-block fast path) ---------------
    batch, in_features, out_features = 8, 32, 16
    key = jax.random.PRNGKey(0)
    x = jax.random.normal(key, (batch, in_features), dtype=jnp.float32)

    module = MockModulePallas(module_type="linear",
                              in_features=in_features,
                              out_features=out_features)

    tag, y = module.forward(x, args=(), kwargs={})
    y = jax.block_until_ready(y)

    # Reference: same bf16 operand quantization as the kernel, f32 accumulate,
    # final cast to the kernel's output dtype.
    x_q = x.astype(jnp.bfloat16).astype(jnp.float32)
    w_q = module.weight_t.astype(jnp.float32)                 # [K, N]
    y_ref = (jnp.dot(x_q, w_q, precision=lax.Precision.HIGHEST)
             + module.bias_2d).astype(y.dtype)

    assert tag == "default_gemm_called"
    assert y.shape == (batch, out_features)
    assert jnp.allclose(y.astype(jnp.float32), y_ref.astype(jnp.float32),
                        atol=2e-2, rtol=2e-2), "fast-path kernel mismatch"

    # --- exercise the tiled path (exactly-tiled, no padding) ---------------
    M2, K2, N2 = 512, 768, 512
    k1, k2, k3 = jax.random.split(jax.random.PRNGKey(1), 3)
    x2 = jax.random.normal(k1, (M2, K2), dtype=jnp.float32)
    w2_t = (jax.random.normal(k2, (K2, N2), dtype=jnp.float32) * 0.05
            ).astype(jnp.bfloat16)
    b2 = jax.random.normal(k3, (N2,), dtype=jnp.float32) * 0.05

    y2 = default_gemm(x2, w2_t, b2, force_tiled=True)
    y2 = jax.block_until_ready(y2)

    y2_ref = (jnp.dot(x2.astype(jnp.bfloat16).astype(jnp.float32),
                      w2_t.astype(jnp.float32),
                      precision=lax.Precision.HIGHEST) + b2).astype(y2.dtype)
    assert y2.shape == (M2, N2)
    assert jnp.allclose(y2.astype(jnp.float32), y2_ref.astype(jnp.float32),
                        atol=5e-2, rtol=5e-2), "tiled kernel mismatch"

    print("KERNEL_OK")
</pallas_src>

<mosaic_0001>
module attributes {stable_mosaic.version = 11 : i64} {
  func.func @_gemm_single_block_kernel(%arg0: memref<8x32xbf16, #tpu.memory_space<vmem>>, %arg1: memref<32x16xbf16, #tpu.memory_space<vmem>>, %arg2: memref<1x16xf32, #tpu.memory_space<vmem>>, %arg3: memref<8x16xbf16, #tpu.memory_space<vmem>>) attributes {dimension_semantics = [], scalar_prefetch = 0 : i64, scratch_operands = 0 : i64, tpu.core_type = #tpu.core_type<tc>} {
    %c0 = arith.constant 0 : index
    %c0_0 = arith.constant 0 : index
    %0 = vector.load %arg0[%c0, %c0_0] : memref<8x32xbf16, #tpu.memory_space<vmem>>, vector<8x32xbf16>
    %c0_1 = arith.constant 0 : index
    %c0_2 = arith.constant 0 : index
    %1 = vector.load %arg1[%c0_1, %c0_2] : memref<32x16xbf16, #tpu.memory_space<vmem>>, vector<32x16xbf16>
    %cst = arith.constant dense<0.000000e+00> : vector<8x16xf32>
    %2 = tpu.matmul %0, %1, %cst {dimension_numbers = #tpu.dot_dimension_numbers<[1], [0], [0], [1], [0, 0, 1, 1], [], []>} : vector<8x32xbf16>, vector<32x16xbf16>, vector<8x16xf32> -> vector<8x16xf32>
    %c0_3 = arith.constant 0 : index
    %c0_4 = arith.constant 0 : index
    %3 = vector.load %arg2[%c0_3, %c0_4] : memref<1x16xf32, #tpu.memory_space<vmem>>, vector<1x16xf32>
    %4 = vector.broadcast %3 : vector<1x16xf32> to vector<8x16xf32>
    %5 = arith.addf %2, %4 : vector<8x16xf32>
    %6 = arith.truncf %5 : vector<8x16xf32> to vector<8x16xbf16>
    %c0_5 = arith.constant 0 : index
    %c0_6 = arith.constant 0 : index
    %7 = vector.load %arg3[%c0_5, %c0_6] : memref<8x16xbf16, #tpu.memory_space<vmem>>, vector<8x16xbf16>
    tpu.vector_store %arg3[%c0_5, %c0_6], %6 {strides = array<i32>} : memref<8x16xbf16, #tpu.memory_space<vmem>>, vector<8x16xbf16>,
    return
  }
}

</mosaic_0001>

<bundles_post_ra>
// kernel: tpu_custom_call.1
= control target key start
LH: loop header
LB: loop body
LE: loop exit
PB: predicated region body
PF: predicated region fallthrough
CT: control target
= control target key end

     0   :  { %v145_v1 = vmov 0.0   ;;  %vm146_vm0 = vmmov 0   ;;  %s192_s0 = inlined_call_operand.vmem [shape: bf16[8,32], index: 0, kind: input, shape index: {}]   ;;  %s193_s1 = inlined_call_operand.vmem [shape: bf16[32,16], index: 1, kind: input, shape index: {}]   ;;  %s194_s2 = inlined_call_operand.vmem [shape: f32[1,16], index: 2, kind: input, shape index: {}]   ;;  %s195_s3 = inlined_call_operand.hbm [shape: bf16[8,16], index: 3, kind: output, shape index: {}]  }
   0x1   :  { %v119_v0 = vld [vmem:[%s193_s1] sm:$0xff]   ;;  %108 = vmatprep.subr.bf16.mxu0 %v145_v1  ;;  %v120_v2 = vld [vmem:[%s193_s1 + $0x8] sm:$0xff]   ;;  %112 = vmatprep.mubr.msk.bf16.mxu0 %vm146_vm0, %v145_v1 }
   0x2   :  { %109 = vmatpush3.bf16.msra.mxu0 %v119_v0 }
   0x3   :  { %110 = vmatprep.subr.bf16.mxu0 %v145_v1 }
   0x4   :  { %8 = vsyncpa [#allocation3], 0  ;;  %v16_v3 = vld [vmem:[%s192_s0] sm:$0xf]  ;;  %vm40_vm1 = vcmask 261120   ;;  %s147_s20 = smov [#allocation2]  }
   0x5   :  { %v101_v4 = vld [vmem:[%s194_s2] ss:$0 sm:$0xff]  ;;  %s93_s21 = sshll.u32 %s147_s20, 4  ;;  %vm85_vm2 = vcmask 125952   ;;  %s94_s21 = int_to_ptr.vmem [resolvable:$true] %s93_s21 }
   0x6   :  { %111 = vmatpush3.bf16.msra.mxu0 %v120_v2  ;;  %s121_s1 = scalar_lea.vmem %s94_s21, 64  ;;  %p126_p1 = scmp.lt.s32.totalorder %s94_s21, %s94_s21 }
   0x7   :  { %p122_p0 = scmp.ne.s32.totalorder %s94_s21, %s121_s1  ;;  %p127_p2 = scmp.lt.s32.totalorder %s121_s1, %s121_s1 }
   0x9   :  { %113 = vmatmul.mubr.msk.bf16.vlgmr.msra.gmra.mrb[0].mxu0 %vm40_vm1, %v16_v3  ;;  %p128_p3 = por %p127_p2, %p126_p1 }
   0xb   :  { %p129_p4 = pnand %p128_p3, %p122_p0 }
  0xdc   :  { %v78_v5 = vpop.f32.mrb[0].mxu0 }
  0xdd   :  { %v79_v6 = vadd.f32 %v101_v4, %v78_v5  ;;  %v114_v7 = vpop.f32.mrb[1].mxu0 }
  0xde   :  { %v81_v8 = vpop.f32.mrb[2].mxu0 }
  0xdf   :  { %v84_v9 = vpack.c.bf16 %v79_v6, %v79_v6  ;;  %v115_v10 = vpop.f32.mrb[3].mxu0 }
  0xe1   :  { %86 = vst.msk [vmem:[#allocation2] sm:$0xf] %vm85_vm2, %v84_v9 }
  0xe2   :  { %132 = shalt.err (!%p129_p4)
}
  0xe3   :  { %s133_s22 = scalar_lea.hbm %s195_s3, 64 }
  0xe4   :  { %p134_p5 = scmp.ne.s32.totalorder %s195_s3, %s133_s22  ;;  %p137_p6 = scmp.lt.u32.totalorder %s133_s22, %s195_s3 }
  0xe6   :  { %p139_p7 = pnand %p137_p6, %p134_p5 }
  0xe8   :  { %142 = shalt.err (!%p139_p7)
}
  0xe9   :  { %96 = dma.vmem_to_hbm [thread:$0]  %s94_s21, 64, %s195_s3, [#allocation3]  }
  0xea   :  { %143 = dma.done.wait [#allocation3], 64  }
  0xeb   :  { %144 = vsyncadd [#allocation3], 4294967232 }
  0xec   :  { %100 = vsyncpa [#allocation3], 1 }

</bundles_post_ra>
